<compile_context>
chip_gen: v6e
topology: v6e:2x2x1
jax: 0.10.0
libtpu: 0.0.40
codegen_flags: <defaults>
</compile_context>

<pallas_src>
import math

import jax
import jax.numpy as jnp
from jax.experimental import pallas as pl
from jax.experimental.pallas import tpu as pltpu


def _round_up(v, m):
    return ((v + m - 1) // m) * m


def _log_shift_exp(s):
    # log(0.01 + exp(s)), stable for large s (identical to torch wherever
    # torch itself is finite; avoids the f32 exp overflow at s ~ 88).
    return jnp.where(
        s > 20.0,
        s + jnp.log1p(0.01 * jnp.exp(-s)),
        jnp.log(0.01 + jnp.exp(jnp.minimum(s, 20.0))),
    )


# ---------------------------------------------------------------------------
# One-shot Bayesian sampling kernel.  Runs once (hoisted out of the conv
# grid); tiled over K so large layers stream through VMEM instead of loading
# three full f32 copies of the weight at once.
# ---------------------------------------------------------------------------
def _bayes_sample_kernel(wmu_ref, wsig_ref, weps_ref, bmu_ref, bsig_ref,
                         w_ref, b_ref):
    std = jnp.maximum(wsig_ref[...], 0.001)
    w_ref[...] = (wmu_ref[...] + weps_ref[...] * _log_shift_exp(std)
                  ).astype(w_ref.dtype)
    # Bias: multiplicative, no noise term -- exactly what conv2d_forward in
    # the torch module computes.
    bstd = jnp.maximum(bsig_ref[...], 0.0001)
    b_ref[...] = (bmu_ref[...] * _log_shift_exp(bstd)).astype(b_ref.dtype)


def bayes_conv2d_forward(x, weight_mu, weight_sigma, weight_eps,
                         bias_mu, bias_sigma,
                         *, stride=(1, 1), padding=(0, 0), dilation=(1, 1),
                         groups=1,
                         compute_dtype=jnp.bfloat16,
                         out_layout="NCHW"):
    """Forward pass of BayesConv2d (groups=1, zero padding)."""
    assert groups == 1, "groups != 1 not supported"  # TODO(synk): grouped conv
    N, C, H, W = x.shape
    OC, Cin, KH, KW = weight_mu.shape
    assert Cin == C
    sh, sw = stride
    ph, pw = padding
    dh, dw = dilation
    OH = (H + 2 * ph - dh * (KH - 1) - 1) // sh + 1
    OW = (W + 2 * pw - dw * (KW - 1) - 1) // sw + 1

    out_dtype = x.dtype
    Cp = _round_up(C, 8)              # channel pad -> aligned per-tap weight rows
    K = KH * KW * Cp                  # contraction (tap-major, channel-minor)
    OCp = _round_up(OC, 128)          # lane-dense output columns / MXU width
    cdt = jnp.dtype(compute_dtype).itemsize
    odt = jnp.dtype(out_dtype).itemsize

    # ---- per-chip knobs ----------------------------------------------------
    try:
        vmem_cap = int(getattr(pltpu.get_tpu_info(), "vmem_capacity_bytes",
                               64 * 2 ** 20))
    except Exception:                 # pragma: no cover - interpret / old jax
        vmem_cap = 64 * 2 ** 20
    vmem_budget = int(0.8 * vmem_cap)   # leave headroom for Mosaic scratch (v7x)

    # Output-row tile: bigger on v5e/v6e (128 MiB VMEM), smaller on v7x.
    target_rows = 1024 if vmem_cap >= 96 * 2 ** 20 else 512
    TOH = max(1, min(OH, pl.cdiv(target_rows, OW)))
    # v7x has 2 TensorCores fed via the "parallel" grid axes: if batch == 1,
    # force >= 2 row tiles so both cores get work (skip on v5e/v6e).
    if vmem_cap < 96 * 2 ** 20 and N == 1 and OH > 1:
        TOH = min(TOH, pl.cdiv(OH, 2))

    Wp = W + 2 * pw
    Cv = _round_up(Cp, 128)           # lane-padded channel width inside VMEM
    OWv = _round_up(OW, 8)

    def _est(toh):                    # rough VMEM bytes for one row-tile config
        ihb = (toh - 1) * sh + (KH - 1) * dh + 1
        return (2 * K * OCp * cdt                      # resident sampled weight
                + 4 * OCp * 4                          # resident bias
                + ihb * _round_up(Wp, 8) * Cv * cdt    # DMA window scratch
                + 2 * toh * OWv * OCp * odt            # output (double buffered)
                + toh * OWv * OCp * 4                  # f32 accumulator values
                + 2 * toh * OWv * Cv * cdt)            # tap-slab temporaries

    while TOH > 1 and _est(TOH) > vmem_budget // 2:
        TOH = max(1, TOH // 2)
    num_t = pl.cdiv(OH, TOH)
    IH_blk = (TOH - 1) * sh + (KH - 1) * dh + 1
    # TODO(synk): K-tile the resident weight for layers where K*OCp alone
    # exceeds the VMEM budget.

    # ---- pad the input once: NCHW->NHWC, zero spatial pad, channel pad, cast.
    # Extra bottom rows so the last row-tile's window DMA stays in bounds
    # (DMA is bounds-checked); those rows only feed output rows >= OH, which
    # the ragged output block drops at writeback.
    extra_h = max(0, (num_t - 1) * TOH * sh + IH_blk - (H + 2 * ph))
    xp = jnp.pad(x.transpose(0, 2, 3, 1),
                 ((0, 0), (ph, ph + extra_h), (pw, pw), (0, Cp - C))
                 ).astype(compute_dtype)               # (N, Hp, Wp, Cp)

    # ---- reorder the (small) weights: (OC, C, KH, KW) -> (K, OCp), tap-major.
    def _reorder(wt):
        wt = jnp.pad(wt, ((0, 0), (0, Cp - C), (0, 0), (0, 0)))
        return jnp.pad(wt.transpose(2, 3, 1, 0).reshape(K, OC),
                       ((0, 0), (0, OCp - OC)))

    wmu, wsig, weps = (_reorder(w) for w in
                       (weight_mu, weight_sigma, weight_eps))
    bmu = jnp.pad(bias_mu.reshape(1, OC), ((0, 0), (0, OCp - OC)))
    bsig = jnp.pad(bias_sigma.reshape(1, OC), ((0, 0), (0, OCp - OC)))

    # ---- hoisted sampling kernel (streamed over K, explicit VMEM limit) ----
    TSK = min(K, 512)
    samp_est = 2 * TSK * OCp * (3 * 4 + cdt) + 8 * OCp * 4
    w_sampled, b_sampled = pl.pallas_call(
        _bayes_sample_kernel,
        out_shape=(jax.ShapeDtypeStruct((K, OCp), compute_dtype),
                   jax.ShapeDtypeStruct((1, OCp), jnp.float32)),
        grid_spec=pltpu.PrefetchScalarGridSpec(
            num_scalar_prefetch=0,
            grid=(pl.cdiv(K, TSK),),
            in_specs=[pl.BlockSpec((TSK, OCp), lambda i: (i, 0)),
                      pl.BlockSpec((TSK, OCp), lambda i: (i, 0)),
                      pl.BlockSpec((TSK, OCp), lambda i: (i, 0)),
                      pl.BlockSpec((1, OCp), lambda i: (0, 0)),
                      pl.BlockSpec((1, OCp), lambda i: (0, 0))],
            out_specs=(pl.BlockSpec((TSK, OCp), lambda i: (i, 0)),
                       pl.BlockSpec((1, OCp), lambda i: (0, 0)))),
        compiler_params=pltpu.CompilerParams(
            dimension_semantics=("arbitrary",),
            vmem_limit_bytes=int(min(vmem_budget,
                                     max(16 * 2 ** 20, 2 * samp_est)))),
    )(wmu, wsig, weps, bmu, bsig)

    # ---- implicit-GEMM conv kernel ------------------------------------------
    def conv_kernel(x_hbm, w_ref, b_ref, o_ref, win_ref, sem):
        n = pl.program_id(0)
        t = pl.program_id(1)
        # Manually DMA this tile's input window (full W, full C, halo rows)
        # straight from HBM -- no materialized im2col patch matrix.
        ih0 = t * (TOH * sh)
        copy = pltpu.make_async_copy(x_hbm.at[n, pl.ds(ih0, IH_blk)],
                                     win_ref, sem)
        copy.start()
        copy.wait()

        win = win_ref[...]                                   # (IH_blk, Wp, Cp)
        # bias initializes the accumulator (no separate finalize add)
        acc = jnp.broadcast_to(b_ref[...],
                               (TOH * OW, OCp)).astype(jnp.float32)
        for kh in range(KH):
            for kw in range(KW):
                h0, w0 = kh * dh, kw * dw
                rows = (win[h0:h0 + TOH] if sh == 1
                        else win[h0:h0 + (TOH - 1) * sh + 1:sh])
                slab = (rows[:, w0:w0 + OW] if sw == 1
                        else rows[:, w0:w0 + (OW - 1) * sw + 1:sw])
                p = slab.reshape(TOH * OW, Cp)               # patch for this tap
                g = kh * KW + kw
                wk = w_ref[g * Cp:(g + 1) * Cp, :]           # (Cp, OCp)
                acc = acc + jnp.dot(p, wk,
                                    preferred_element_type=jnp.float32)
        o_ref[...] = acc.reshape(1, TOH, OW, OCp).astype(o_ref.dtype)

    conv_vmem = int(min(vmem_budget, max(32 * 2 ** 20, 2 * _est(TOH))))
    out = pl.pallas_call(
        conv_kernel,
        out_shape=jax.ShapeDtypeStruct((N, OH, OW, OCp), out_dtype),
        grid_spec=pltpu.PrefetchScalarGridSpec(
            num_scalar_prefetch=0,
            grid=(N, num_t),
            in_specs=[
                pl.BlockSpec(memory_space=pl.ANY),             # x stays in HBM
                pl.BlockSpec((K, OCp), lambda n, t: (0, 0)),   # resident weight
                pl.BlockSpec((1, OCp), lambda n, t: (0, 0)),   # resident bias
            ],
            out_specs=pl.BlockSpec((1, TOH, OW, OCp),
                                   lambda n, t: (n, t, 0, 0)),
            scratch_shapes=[pltpu.VMEM((IH_blk, Wp, Cp), compute_dtype),
                            pltpu.SemaphoreType.DMA],
        ),
        compiler_params=pltpu.CompilerParams(
            dimension_semantics=("parallel", "parallel"),
            vmem_limit_bytes=conv_vmem),
    )(xp, w_sampled, b_sampled)

    out = out[..., :OC]                    # drop OC lane padding
    if out_layout == "NHWC":               # skip the extra transpose pass
        return out
    return out.transpose(0, 3, 1, 2)       # NCHW (torch layout)


def _xavier_uniform(key, shape):
    # PyTorch xavier_uniform_ for conv weight (OC, C, KH, KW)
    fan_in = shape[1] * shape[2] * shape[3]
    fan_out = shape[0] * shape[2] * shape[3]
    bound = math.sqrt(6.0 / (fan_in + fan_out))
    return jax.random.uniform(key, shape, jnp.float32, -bound, bound)


if __name__ == "__main__":
    # Small shapes consistent with the module: N=2, C_in=4, H=W=16,
    # C_out=8, kernel 3x3, stride 1, padding 1.
    N, C, H, W = 2, 4, 16, 16
    OC, KH, KW = 8, 3, 3
    stride, padding, dilation = (1, 1), (1, 1), (1, 1)

    root = jax.random.PRNGKey(0)
    k_x, k_wmu, k_wsig, k_bmu, k_bsig, k_eps = jax.random.split(root, 6)

    # Deterministic "parameter init" mirroring __init__
    x = jax.random.normal(k_x, (N, C, H, W), jnp.float32)
    weight_mu = _xavier_uniform(k_wmu, (OC, C, KH, KW))
    weight_sigma = _xavier_uniform(k_wsig, (OC, C, KH, KW)) * 0.01
    bias_mu = jax.random.uniform(k_bmu, (OC,), jnp.float32, -1.0, 1.0)
    bias_sigma = jax.random.uniform(k_bsig, (OC,), jnp.float32, -1.0, 1.0)
    # eps = torch.randn_like(weight_sigma) -> deterministic normal draw here
    weight_eps = jax.random.normal(k_eps, (OC, C, KH, KW), jnp.float32)

    # Pure-JAX reference (same sampled weight/bias)
    w_ref = weight_mu + weight_eps * jnp.log(
        0.01 + jnp.exp(jnp.maximum(weight_sigma, 0.001)))
    b_ref = bias_mu * jnp.log(0.01 + jnp.exp(jnp.maximum(bias_sigma, 0.0001)))
    y_ref = jax.lax.conv_general_dilated(
        x, w_ref, window_strides=stride,
        padding=((padding[0], padding[0]), (padding[1], padding[1])),
        rhs_dilation=dilation,
        dimension_numbers=("NCHW", "OIHW", "NCHW")) + b_ref[None, :, None, None]

    # f32 compute path: strict check
    y32 = bayes_conv2d_forward(x, weight_mu, weight_sigma, weight_eps,
                               bias_mu, bias_sigma,
                               stride=stride, padding=padding,
                               dilation=dilation,
                               compute_dtype=jnp.float32)
    y32 = jax.block_until_ready(y32)
    assert y32.shape == (N, OC, H, W)
    assert jnp.allclose(y32, y_ref, rtol=1e-4, atol=1e-4), "f32 mismatch"

    # bf16 compute path (default; MXU fast path): loose check
    y16 = bayes_conv2d_forward(x, weight_mu, weight_sigma, weight_eps,
                               bias_mu, bias_sigma,
                               stride=stride, padding=padding,
                               dilation=dilation,
                               compute_dtype=jnp.bfloat16)
    y16 = jax.block_until_ready(y16)
    assert y16.shape == (N, OC, H, W)
    assert jnp.allclose(y16, y_ref, rtol=2e-2, atol=5e-2), "bf16 mismatch"

    print("KERNEL_OK")
</pallas_src>

<mosaic_0001>
module attributes {stable_mosaic.version = 11 : i64} {
  func.func @_bayes_sample_kernel(%arg0: i32, %arg1: memref<72x128xf32, #tpu.memory_space<vmem>>, %arg2: memref<72x128xf32, #tpu.memory_space<vmem>>, %arg3: memref<72x128xf32, #tpu.memory_space<vmem>>, %arg4: memref<1x128xf32, #tpu.memory_space<vmem>>, %arg5: memref<1x128xf32, #tpu.memory_space<vmem>>, %arg6: memref<72x128xf32, #tpu.memory_space<vmem>>, %arg7: memref<1x128xf32, #tpu.memory_space<vmem>>) attributes {dimension_semantics = [#tpu.dimension_semantics<arbitrary>], iteration_bounds = array<i64: 1>, scalar_prefetch = 0 : i64, scratch_operands = 0 : i64, tpu.core_type = #tpu.core_type<tc>, window_params = [{transform_indices = @transform_0, window_bounds = array<i64: 72, 128>}, {transform_indices = @transform_1, window_bounds = array<i64: 72, 128>}, {transform_indices = @transform_2, window_bounds = array<i64: 72, 128>}, {pipeline_mode = #tpu.pipeline_mode<synchronous>, transform_indices = @transform_3, window_bounds = array<i64: 1, 128>}, {pipeline_mode = #tpu.pipeline_mode<synchronous>, transform_indices = @transform_4, window_bounds = array<i64: 1, 128>}, {transform_indices = @transform_5, window_bounds = array<i64: 72, 128>}, {pipeline_mode = #tpu.pipeline_mode<synchronous>, transform_indices = @transform_6, window_bounds = array<i64: 1, 128>}]} {
    %c0 = arith.constant 0 : index
    %c0_0 = arith.constant 0 : index
    %0 = vector.load %arg2[%c0, %c0_0] : memref<72x128xf32, #tpu.memory_space<vmem>>, vector<72x128xf32>
    %cst = arith.constant 1.000000e-03 : f32
    %1 = vector.broadcast %cst : f32 to vector<72x128xf32>
    %2 = arith.maximumf %0, %1 : vector<72x128xf32>
    %c0_1 = arith.constant 0 : index
    %c0_2 = arith.constant 0 : index
    %3 = vector.load %arg1[%c0_1, %c0_2] : memref<72x128xf32, #tpu.memory_space<vmem>>, vector<72x128xf32>
    %c0_3 = arith.constant 0 : index
    %c0_4 = arith.constant 0 : index
    %4 = vector.load %arg3[%c0_3, %c0_4] : memref<72x128xf32, #tpu.memory_space<vmem>>, vector<72x128xf32>
    %cst_5 = arith.constant 2.000000e+01 : f32
    %5 = vector.broadcast %cst_5 : f32 to vector<72x128xf32>
    %6 = arith.cmpf ogt, %2, %5 : vector<72x128xf32>
    %cst_6 = arith.constant 0.000000e+00 : f32
    %7 = vector.broadcast %cst_6 : f32 to vector<72x128xf32>
    %8 = arith.subf %7, %2 : vector<72x128xf32>
    %9 = math.exp %8 : vector<72x128xf32>
    %cst_7 = arith.constant 0.00999999977 : f32
    %10 = vector.broadcast %cst_7 : f32 to vector<72x128xf32>
    %11 = arith.mulf %10, %9 : vector<72x128xf32>
    %12 = math.log1p %11 : vector<72x128xf32>
    %13 = arith.addf %2, %12 : vector<72x128xf32>
    %cst_8 = arith.constant 2.000000e+01 : f32
    %14 = vector.broadcast %cst_8 : f32 to vector<72x128xf32>
    %15 = arith.minimumf %2, %14 : vector<72x128xf32>
    %16 = math.exp %15 : vector<72x128xf32>
    %cst_9 = arith.constant 0.00999999977 : f32
    %17 = vector.broadcast %cst_9 : f32 to vector<72x128xf32>
    %18 = arith.addf %17, %16 : vector<72x128xf32>
    %19 = math.log %18 : vector<72x128xf32>
    %20 = arith.select %6, %13, %19 : vector<72x128xi1>, vector<72x128xf32>
    %21 = arith.mulf %4, %20 : vector<72x128xf32>
    %22 = arith.addf %3, %21 : vector<72x128xf32>
    %c0_10 = arith.constant 0 : index
    %c0_11 = arith.constant 0 : index
    %23 = vector.load %arg6[%c0_10, %c0_11] : memref<72x128xf32, #tpu.memory_space<vmem>>, vector<72x128xf32>
    tpu.vector_store %arg6[%c0_10, %c0_11], %22 {strides = array<i32>} : memref<72x128xf32, #tpu.memory_space<vmem>>, vector<72x128xf32>,
    %c0_12 = arith.constant 0 : index
    %c0_13 = arith.constant 0 : index
    %24 = vector.load %arg5[%c0_12, %c0_13] : memref<1x128xf32, #tpu.memory_space<vmem>>, vector<1x128xf32>
    %cst_14 = arith.constant 9.99999974E-5 : f32
    %25 = vector.broadcast %cst_14 : f32 to vector<1x128xf32>
    %26 = arith.maximumf %24, %25 : vector<1x128xf32>
    %c0_15 = arith.constant 0 : index
    %c0_16 = arith.constant 0 : index
    %27 = vector.load %arg4[%c0_15, %c0_16] : memref<1x128xf32, #tpu.memory_space<vmem>>, vector<1x128xf32>
    %cst_17 = arith.constant 2.000000e+01 : f32
    %28 = vector.broadcast %cst_17 : f32 to vector<1x128xf32>
    %29 = arith.cmpf ogt, %26, %28 : vector<1x128xf32>
    %cst_18 = arith.constant 0.000000e+00 : f32
    %30 = vector.broadcast %cst_18 : f32 to vector<1x128xf32>
    %31 = arith.subf %30, %26 : vector<1x128xf32>
    %32 = math.exp %31 : vector<1x128xf32>
    %cst_19 = arith.constant 0.00999999977 : f32
    %33 = vector.broadcast %cst_19 : f32 to vector<1x128xf32>
    %34 = arith.mulf %33, %32 : vector<1x128xf32>
    %35 = math.log1p %34 : vector<1x128xf32>
    %36 = arith.addf %26, %35 : vector<1x128xf32>
    %cst_20 = arith.constant 2.000000e+01 : f32
    %37 = vector.broadcast %cst_20 : f32 to vector<1x128xf32>
    %38 = arith.minimumf %26, %37 : vector<1x128xf32>
    %39 = math.exp %38 : vector<1x128xf32>
    %cst_21 = arith.constant 0.00999999977 : f32
    %40 = vector.broadcast %cst_21 : f32 to vector<1x128xf32>
    %41 = arith.addf %40, %39 : vector<1x128xf32>
    %42 = math.log %41 : vector<1x128xf32>
    %43 = arith.select %29, %36, %42 : vector<1x128xi1>, vector<1x128xf32>
    %44 = arith.mulf %27, %43 : vector<1x128xf32>
    %c0_22 = arith.constant 0 : index
    %c0_23 = arith.constant 0 : index
    %45 = vector.load %arg7[%c0_22, %c0_23] : memref<1x128xf32, #tpu.memory_space<vmem>>, vector<1x128xf32>
    tpu.vector_store %arg7[%c0_22, %c0_23], %44 {strides = array<i32>} : memref<1x128xf32, #tpu.memory_space<vmem>>, vector<1x128xf32>,
    return
  }
  func.func @transform_0(%arg0: i32) -> (i32, i32) {
    %c0_i32 = arith.constant 0 : i32
    %c0_i32_0 = arith.constant 0 : i32
    return %arg0, %c0_i32 : i32, i32
  }
  func.func @transform_1(%arg0: i32) -> (i32, i32) {
    %c0_i32 = arith.constant 0 : i32
    %c0_i32_0 = arith.constant 0 : i32
    return %arg0, %c0_i32 : i32, i32
  }
  func.func @transform_2(%arg0: i32) -> (i32, i32) {
    %c0_i32 = arith.constant 0 : i32
    %c0_i32_0 = arith.constant 0 : i32
    return %arg0, %c0_i32 : i32, i32
  }
  func.func @transform_3(%arg0: i32) -> (i32, i32) {
    %c0_i32 = arith.constant 0 : i32
    %c0_i32_0 = arith.constant 0 : i32
    %c0_i32_1 = arith.constant 0 : i32
    return %c0_i32, %c0_i32_0 : i32, i32
  }
  func.func @transform_4(%arg0: i32) -> (i32, i32) {
    %c0_i32 = arith.constant 0 : i32
    %c0_i32_0 = arith.constant 0 : i32
    %c0_i32_1 = arith.constant 0 : i32
    return %c0_i32, %c0_i32_0 : i32, i32
  }
  func.func @transform_5(%arg0: i32) -> (i32, i32) {
    %c0_i32 = arith.constant 0 : i32
    %c0_i32_0 = arith.constant 0 : i32
    return %arg0, %c0_i32 : i32, i32
  }
  func.func @transform_6(%arg0: i32) -> (i32, i32) {
    %c0_i32 = arith.constant 0 : i32
    %c0_i32_0 = arith.constant 0 : i32
    %c0_i32_1 = arith.constant 0 : i32
    return %c0_i32, %c0_i32_0 : i32, i32
  }
}

</mosaic_0001>

<bundles_post_ra>
// kernel: tpu_custom_call.1
= control target key start
LH: loop header
LB: loop body
LE: loop exit
PB: predicated region body
PF: predicated region fallthrough
CT: control target
= control target key end

     0   :  { %12 = vsyncpa [#allocation3], 0  ;;  %s807_s0 = inlined_call_operand.hbm [shape: f32[72,128], index: 0, kind: input, shape index: {}]   ;;  %s808_s1 = inlined_call_operand.hbm [shape: f32[72,128], index: 1, kind: input, shape index: {}]   ;;  %s809_s2 = inlined_call_operand.hbm [shape: f32[72,128], index: 2, kind: input, shape index: {}]   ;;  %s810_s3 = inlined_call_operand.vmem [shape: f32[1,128], index: 3, kind: input, shape index: {}]   ;;  %s811_s4 = inlined_call_operand.vmem [shape: f32[1,128], index: 4, kind: input, shape index: {}]   ;;  %s812_s5 = inlined_call_operand.hbm [shape: f32[72,128], index: 5, kind: output, shape index: {0}]   ;;  %s813_s6 = inlined_call_operand.hbm [shape: f32[1,128], index: 6, kind: output, shape index: {1}]  }
   0x1   :  { %13 = vsyncpa [#allocation6], 0 }
   0x2   :  { %14 = vsyncpa [#allocation4], 0 }
   0x3   :  { %15 = vsyncpa [#allocation10], 0  ;;  %s580_s21 = smov [#allocation5]   ;;  %s581_s23 = smov [#allocation2]  }
   0x4   :  { %s33_s22 = sshll.u32 %s580_s21, 4  ;;  %s21_s24 = sshll.u32 %s581_s23, 4  ;;  %s34_s22 = int_to_ptr.vmem [resolvable:$true] %s33_s22  ;;  %s22_s24 = int_to_ptr.vmem [resolvable:$true] %s21_s24 }
   0x5   :  { %s480_s25 = scalar_lea.vmem %s34_s22, 1152  ;;  %p485_p1 = scmp.lt.s32.totalorder %s34_s22, %s34_s22 }
   0x6   :  { %p481_p0 = scmp.ne.s32.totalorder %s34_s22, %s480_s25  ;;  %p486_p2 = scmp.lt.s32.totalorder %s480_s25, %s480_s25 }
   0x8   :  { %p487_p3 = por %p486_p2, %p485_p1 }
   0xa   :  { %p488_p4 = pnand %p487_p3, %p481_p0 }
   0xc   :  { %491 = shalt.err (!%p488_p4)
}
   0xd   :  { %s582_s26 = smov 128   ;;  %s583_s27 = smov 8  }
   0xe   :  { %39 = dma.hbm_to_vmem [thread:$0]  %s808_s1, 1152, %s34_s22, [#allocation6], %s582_s26, %s582_s26, %s583_s27  }
   0xf   :  { %s500_s30 = scalar_lea.vmem %s22_s24, 1152  ;;  %p505_p6 = scmp.lt.s32.totalorder %s22_s24, %s22_s24 }
  0x10   :  { %p501_p5 = scmp.ne.s32.totalorder %s22_s24, %s500_s30  ;;  %p506_p7 = scmp.lt.s32.totalorder %s500_s30, %s500_s30 }
  0x12   :  { %p507_p8 = por %p506_p7, %p505_p6 }
  0x14   :  { %p508_p9 = pnand %p507_p8, %p501_p5 }
  0x16   :  { %511 = shalt.err (!%p508_p9)
}
  0x17   :  { %27 = dma.hbm_to_vmem [thread:$0]  %s807_s0, 1152, %s22_s24, [#allocation3], %s582_s26, %s582_s26, %s583_s27  }
  0x18   :  { %s584_s9 = smov [#allocation7]  }
  0x19   :  { %s45_s10 = sshll.u32 %s584_s9, 4  ;;  %s46_s10 = int_to_ptr.vmem [resolvable:$true] %s45_s10 }
  0x1a   :  { %s520_s11 = scalar_lea.vmem %s46_s10, 1152  ;;  %p525_p11 = scmp.lt.s32.totalorder %s46_s10, %s46_s10 }
  0x1b   :  { %p521_p10 = scmp.ne.s32.totalorder %s46_s10, %s520_s11  ;;  %p526_p12 = scmp.lt.s32.totalorder %s520_s11, %s520_s11 }
  0x1d   :  { %p527_p13 = por %p526_p12, %p525_p11 }
  0x1f   :  { %p528_p0 = pnand %p527_p13, %p521_p10 }
  0x21   :  { %531 = shalt.err (!%p528_p0)
}
  0x22   :  { %51 = dma.hbm_to_vmem [thread:$0]  %s809_s2, 1152, %s46_s10, [#allocation6], %s582_s26, %s582_s26, %s583_s27  }
  0x23   :  { %572 = dma.done.wait [#allocation3], 1152  }
  0x24   :  { %573 = vsyncadd [#allocation3], 4294966144 }
  0x25   :  { %574 = dma.done.wait [#allocation6], 2304  }
  0x26   :  { %575 = vsyncadd [#allocation6], 4294964992  ;;  %v65_v0 = vld [vmem:[#allocation5] sm:$0xff]  ;;  %v66_v2 = vld [vmem:[#allocation5 + $0x8] sm:$0xff]  ;;  %s586_s14 = smov [#allocation9]  }
  0x27   :  { %v640_v1 = vmax.f32 %v65_v0, 0.001  ;;  %v642_v3 = vmax.f32 %v66_v2, 0.001  ;;  %v67_v4 = vld [vmem:[#allocation5 + $0x10] sm:$0xff]  ;;  %v68_v8 = vld [vmem:[#allocation5 + $0x18] sm:$0xff] }
  0x28   :  { %v646_v7 = vmax.f32 %v67_v4, 0.001  ;;  %v650_v11 = vmax.f32 %v68_v8, 0.001  ;;  %v69_v20 = vld [vmem:[#allocation5 + $0x20] sm:$0xff]  ;;  %v70_v25 = vld [vmem:[#allocation5 + $0x28] sm:$0xff] }
  0x29   :  { %v110_v5 = vsub.f32 0.0, %v640_v1  ;;  %v236_v6 = vmin.f32 %v640_v1, 20.0  ;;  %v111_v9 = vsub.f32 0.0, %v642_v3  ;;  %v237_v10 = vmin.f32 %v642_v3, 20.0  ;;  %v71_v28 = vld [vmem:[#allocation5 + $0x30] sm:$0xff]  ;;  %v72_v33 = vld [vmem:[#allocation5 + $0x38] sm:$0xff] }
  0x2a   :  { %v112_v14 = vsub.f32 0.0, %v646_v7  ;;  %v238_v17 = vmin.f32 %v646_v7, 20.0  ;;  %v113_v19 = vsub.f32 0.0, %v650_v11  ;;  %v239_v22 = vmin.f32 %v650_v11, 20.0  ;;  %v73_v45 = vld [vmem:[#allocation5 + $0x40] sm:$0xff]  ;;  %s371_s15 = sshll.u32 %s586_s14, 4  ;;  %s372_s15 = int_to_ptr.vmem [resolvable:$true] %s371_s15 }
  0x2b   :  { %v119_v12 = vmul.f32 1.442695, %v110_v5  ;;  %v245_v13 = vmul.f32 1.442695, %v236_v6  ;;  %v121_v15 = vmul.f32 1.442695, %v111_v9 }
  0x2c   :  { %v247_v16 = vmul.f32 1.442695, %v237_v10  ;;  %v123_v18 = vmul.f32 1.442695, %v112_v14  ;;  %v249_v21 = vmul.f32 1.442695, %v238_v17 }
  0x2d   :  { %392 = vpow2.f32 %v119_v12  ;;  %v656_v23 = vmax.f32 %v69_v20, 0.001  ;;  %v125_v24 = vmul.f32 1.442695, %v113_v19  ;;  %v251_v26 = vmul.f32 1.442695, %v239_v22 }
  0x2e   :  { %394 = vpow2.f32 %v245_v13  ;;  %v660_v30 = vmax.f32 %v70_v25, 0.001  ;;  %v662_v31 = vmax.f32 %v71_v28, 0.001  ;;  %v668_v40 = vmax.f32 %v72_v33, 0.001 }
  0x2f   :  { %396 = vpow2.f32 %v121_v15  ;;  %v114_v27 = vsub.f32 0.0, %v656_v23  ;;  %v240_v29 = vmin.f32 %v656_v23, 20.0  ;;  %v326_v47 = vld [vmem:[%s811_s4] sm:$0x1]  ;;  %v675_v51 = vmax.f32 %v73_v45, 0.001 }
  0x30   :  { %398 = vpow2.f32 %v247_v16  ;;  %v115_v35 = vsub.f32 0.0, %v660_v30  ;;  %v241_v36 = vmin.f32 %v660_v30, 20.0  ;;  %v116_v37 = vsub.f32 0.0, %v662_v31  ;;  %s585_s4 = smov [#allocation8]  }
  0x31   :  { %400 = vpow2.f32 %v123_v18  ;;  %v127_v32 = vmul.f32 1.442695, %v114_v27  ;;  %v253_v34 = vmul.f32 1.442695, %v240_v29  ;;  %v242_v39 = vmin.f32 %v662_v31, 20.0  ;;  %s358_s13 = sshll.u32 %s585_s4, 4  ;;  %s359_s13 = int_to_ptr.vmem [resolvable:$true] %s358_s13 }
  0x32   :  { %402 = vpow2.f32 %v249_v21  ;;  %v129_v38 = vmul.f32 1.442695, %v115_v35  ;;  %v255_v41 = vmul.f32 1.442695, %v241_v36  ;;  %v131_v42 = vmul.f32 1.442695, %v116_v37  ;;  %p537_p2 = scmp.lt.s32.totalorder %s359_s13, %s359_s13 }
  0x33   :  { %404 = vpow2.f32 %v125_v24  ;;  %v257_v43 = vmul.f32 1.442695, %v242_v39  ;;  %v117_v44 = vsub.f32 0.0, %v668_v40  ;;  %v243_v46 = vmin.f32 %v668_v40, 20.0  ;;  %s532_s18 = scalar_lea.vmem %s359_s13, 1152 }
  0x34   :  { %406 = vpow2.f32 %v251_v26  ;;  %v677_v54 = vmax.f32 %v326_v47, 0.0001  ;;  %v118_v63 = vsub.f32 0.0, %v675_v51  ;;  %v244_v4 = vmin.f32 %v675_v51, 20.0  ;;  %p533_p1 = scmp.ne.s32.totalorder %s359_s13, %s532_s18  ;;  %p538_p3 = scmp.lt.s32.totalorder %s532_s18, %s532_s18 }
  0x35   :  { %408 = vpow2.f32 %v127_v32  ;;  %v133_v48 = vmul.f32 1.442695, %v117_v44  ;;  %v259_v50 = vmul.f32 1.442695, %v243_v46  ;;  %vm101_vm2 = vcmp.gt.f32.partialorder %v640_v1, 20.0 }
  0x36   :  { %410 = vpow2.f32 %v253_v34  ;;  %v330_v5 = vsub.f32 0.0, %v677_v54  ;;  %v344_v10 = vmin.f32 %v677_v54, 20.0  ;;  %v688_v20 = vmul.f32 1.442695, %v118_v63  ;;  %p539_p4 = por %p538_p3, %p537_p2 }
  0x37   :  { %412 = vpow2.f32 %v129_v38  ;;  %v690_v24 = vmul.f32 1.442695, %v244_v4  ;;  %vm102_vm3 = vcmp.gt.f32.partialorder %v642_v3, 20.0  ;;  %vm103_vm5 = vcmp.gt.f32.partialorder %v646_v7, 20.0 }
  0x38   :  { %414 = vpow2.f32 %v255_v41  ;;  %v692_v25 = vmul.f32 1.442695, %v330_v5  ;;  %v698_v29 = vmul.f32 1.442695, %v344_v10  ;;  %vm104_vm7 = vcmp.gt.f32.partialorder %v650_v11, 20.0  ;;  %p540_p5 = pnand %p539_p4, %p533_p1 }
  0x39   :  { %416 = vpow2.f32 %v131_v42  ;;  %vm105_vm10 = vcmp.gt.f32.partialorder %v656_v23, 20.0  ;;  %vm106_vm11 = vcmp.gt.f32.partialorder %v660_v30, 20.0  ;;  %vm107_vm13 = vcmp.gt.f32.partialorder %v662_v31, 20.0 }
  0x3a   :  { %v393_v49 = vpop.eup %392  ;;  %418 = vpow2.f32 %v257_v43  ;;  %vm108_vm15 = vcmp.gt.f32.partialorder %v668_v40, 20.0 }
  0x3b   :  { %v395_v52 = vpop.eup %394  ;;  %v137_v53 = vmul.f32 0.01, %v393_v49  ;;  %420 = vpow2.f32 %v133_v48 }
  0x3c   :  { %v397_v55 = vpop.eup %396  ;;  %v263_v56 = vadd.f32 0.01, %v395_v52  ;;  %422 = vpow2.f32 %v259_v50 }
  0x3d   :  { %v399_v57 = vpop.eup %398  ;;  %v146_v58 = vadd.f32 1.0, %v137_v53  ;;  %v679_v59 = vmul.f32 0.01, %v397_v55  ;;  %v149_v61 = vmul.f32 -0.5, %v137_v53  ;;  %v152_v8 = vand.u32 2147483647, %v137_v53 }
  0x3e   :  { %v401_v60 = vpop.eup %400  ;;  %424 = vlog2.f32 %v263_v56  ;;  %v264_v62 = vadd.f32 0.01, %v399_v57 }
  0x3f   :  { %v403_v0 = vpop.eup %402  ;;  %426 = vlog2.f32 %v146_v58  ;;  %v155_v2 = vadd.f32 1.0, %v679_v59  ;;  %v139_v9 = vmul.f32 0.01, %v401_v60  ;;  %v158_v13 = vmul.f32 -0.5, %v679_v59 }
  0x40   :  { %v405_v6 = vpop.eup %404  ;;  %428 = vlog2.f32 %v264_v62  ;;  %v265_v14 = vadd.f32 0.01, %v403_v0  ;;  %v150_v17 = vadd.f32 1.0, %v149_v61  ;;  %v161_v18 = vand.u32 2147483647, %v679_v59 }
  0x41   :  { %v407_v12 = vpop.eup %406  ;;  %430 = vlog2.f32 %v155_v2  ;;  %v140_v15 = vmul.f32 0.01, %v405_v6  ;;  %v164_v19 = vadd.f32 1.0, %v139_v9  ;;  %vm694_vm0 = vcmp.lt.f32.partialorder %v152_v8, 0.0004427343 }
  0x42   :  { %v409_v16 = vpop.eup %408  ;;  %432 = vlog2.f32 %v265_v14  ;;  %v167_v28 = vmul.f32 -0.5, %v139_v9  ;;  %v159_v33 = vadd.f32 1.0, %v158_v13  ;;  %v266_v35 = vadd.f32 0.01, %v407_v12 }
  0x43   :  { %v411_v21 = vpop.eup %410  ;;  %v173_v22 = vadd.f32 1.0, %v140_v15  ;;  %434 = vlog2.f32 %v164_v19  ;;  %v176_v34 = vmul.f32 -0.5, %v140_v15  ;;  %v151_v36 = vmul.f32 %v150_v17, %v137_v53  ;;  %v87_v19 = vld [vmem:[#allocation2 + $0x20] sm:$0xff] }
  0x44   :  { %v413_v26 = vpop.eup %412  ;;  %vm700_vm1 = vcmp.lt.f32.partialorder %v161_v18, 0.0004427343  ;;  %v141_v38 = vmul.f32 0.01, %v409_v16  ;;  %v267_v39 = vadd.f32 0.01, %v411_v21  ;;  %v160_v56 = vmul.f32 %v159_v33, %v679_v59 }
  0x45   :  { %v415_v32 = vpop.eup %414  ;;  %436 = vlog2.f32 %v173_v22  ;;  %v170_v42 = vand.u32 2147483647, %v139_v9  ;;  %v705_v43 = vmul.f32 0.01, %v413_v26  ;;  %v168_v46 = vadd.f32 1.0, %v167_v28  ;;  %v92_v26 = vld [vmem:[#allocation7] sm:$0xff] }
  0x46   :  { %v417_v41 = vpop.eup %416  ;;  %438 = vlog2.f32 %v266_v35  ;;  %v268_v44 = vadd.f32 0.01, %v415_v32  ;;  %v179_v47 = vand.u32 2147483647, %v140_v15  ;;  %v182_v48 = vadd.f32 1.0, %v141_v38 }
  0x47   :  { %v419_v45 = vpop.eup %418  ;;  %440 = vlog2.f32 %v267_v39  ;;  %v177_v50 = vadd.f32 1.0, %v176_v34  ;;  %v185_v52 = vmul.f32 -0.5, %v141_v38  ;;  %v191_v53 = vadd.f32 1.0, %v705_v43 }
  0x48   :  { %v421_v49 = vpop.eup %420  ;;  %442 = vlog2.f32 %v268_v44  ;;  %v194_v57 = vmul.f32 -0.5, %v705_v43  ;;  %v711_v58 = vmul.f32 0.01, %v417_v41  ;;  %vm713_vm4 = vcmp.lt.f32.partialorder %v170_v42, 0.0004427343  ;;  %v83_v42 = vld [vmem:[#allocation2] sm:$0xff] }
  0x49   :  { %v423_v55 = vpop.eup %422  ;;  %444 = vlog2.f32 %v182_v48  ;;  %v188_v62 = vand.u32 2147483647, %v141_v38  ;;  %v269_v63 = vadd.f32 0.01, %v419_v45  ;;  %v169_v2 = vmul.f32 %v168_v46, %v139_v9  ;;  %v93_v45 = vld [vmem:[#allocation7 + $0x8] sm:$0xff] }
  0x4a   :  { %446 = vlog2.f32 %v191_v53  ;;  %vm718_vm6 = vcmp.lt.f32.partialorder %v179_v47, 0.0004427343  ;;  %v197_v59 = vand.u32 2147483647, %v705_v43  ;;  %v200_v5 = vadd.f32 1.0, %v711_v58 }
  0x4b   :  { %v425_v60 = vpop.eup %424  ;;  %v178_v10 = vmul.f32 %v177_v50, %v140_v15  ;;  %v186_v12 = vadd.f32 1.0, %v185_v52  ;;  %448 = vlog2.f32 %v269_v63  ;;  %v195_v16 = vadd.f32 1.0, %v194_v57  ;;  %v84_v52 = vld [vmem:[#allocation2 + $0x8] sm:$0xff] }
  0x4c   :  { %v427_v0 = vpop.eup %426  ;;  %v273_v14 = vmul.f32 0.6931472, %v425_v60  ;;  %450 = vlog2.f32 %v200_v5  ;;  %v725_v9 = vmul.f32 0.01, %v421_v49  ;;  %vm729_vm8 = vcmp.lt.f32.partialorder %v188_v62, 0.0004427343 }
  0x4d   :  { %v429_v6 = vpop.eup %428  ;;  %v148_v8 = vmul.f32 0.6931472, %v427_v0  ;;  %v203_v21 = vmul.f32 -0.5, %v711_v58  ;;  %v270_v22 = vadd.f32 0.01, %v423_v55  ;;  %v196_v55 = vmul.f32 %v195_v16, %v705_v43  ;;  %v94_v62 = vld [vmem:[#allocation7 + $0x10] sm:$0xff] }
  0x4e   :  { %v431_v13 = vpop.eup %430  ;;  %v275_v32 = vmul.f32 0.6931472, %v429_v6  ;;  %vm735_vm9 = vcmp.lt.f32.partialorder %v197_v59, 0.0004427343  ;;  %v209_v27 = vadd.f32 1.0, %v725_v9  ;;  %v95_v5 = vld [vmem:[#allocation7 + $0x18] sm:$0xff] }
  0x4f   :  { %v154_v17 = vsel %vm694_vm0, %v151_v36, %v148_v8  ;;  %v157_v18 = vmul.f32 0.6931472, %v431_v13  ;;  %v433_v15 = vpop.eup %432  ;;  %v187_v36 = vmul.f32 %v186_v12, %v141_v38  ;;  %v206_v39 = vand.u32 2147483647, %v711_v58  ;;  %v85_v8 = vld [vmem:[#allocation2 + $0x10] sm:$0xff] }
  0x50   :  { %v227_v28 = vadd.f32 %v154_v17, %v640_v1  ;;  %v435_v34 = vpop.eup %434  ;;  %452 = vlog2.f32 %v270_v22  ;;  %v277_v49 = vmul.f32 0.6931472, %v433_v15  ;;  %v204_v38 = vadd.f32 1.0, %v203_v21 }
  0x51   :  { %v163_v35 = vsel %vm700_vm1, %v160_v56, %v157_v18  ;;  %v166_v47 = vmul.f32 0.6931472, %v435_v34  ;;  %454 = vlog2.f32 %v209_v27  ;;  %vm758_vm12 = vcmp.lt.f32.partialorder %v206_v39, 0.0004427343 }
  0x52   :  { %v437_v41 = vpop.eup %436  ;;  %v290_v44 = vsel %vm101_vm2, %v227_v28, %v273_v14  ;;  %v228_v46 = vadd.f32 %v163_v35, %v642_v3  ;;  %456 = vpow2.f32 %v688_v20  ;;  %v212_v20 = vmul.f32 -0.5, %v725_v9  ;;  %v86_v14 = vld [vmem:[#allocation2 + $0x18] sm:$0xff] }
  0x53   :  { %v299_v48 = vmul.f32 %v290_v44, %v92_v26  ;;  %v175_v37 = vmul.f32 0.6931472, %v437_v41  ;;  %v439_v50 = vpop.eup %438  ;;  %v172_v1 = vsel %vm713_vm4, %v169_v2, %v166_v47  ;;  %v205_v4 = vmul.f32 %v204_v38, %v711_v58  ;;  %v97_v35 = vld [vmem:[#allocation7 + $0x28] sm:$0xff] }
  0x54   :  { %v291_v53 = vsel %vm102_vm3, %v228_v46, %v275_v32  ;;  %v441_v56 = vpop.eup %440  ;;  %v229_v63 = vadd.f32 %v172_v1, %v646_v7  ;;  %v279_v6 = vmul.f32 0.6931472, %v439_v50  ;;  %458 = vpow2.f32 %v690_v24  ;;  %v89_v1 = vld [vmem:[#allocation2 + $0x30] sm:$0xff] }
  0x55   :  { %v308_v57 = vadd.f32 %v299_v48, %v83_v42  ;;  %v300_v60 = vmul.f32 %v291_v53, %v93_v45  ;;  %v181_v0 = vsel %vm718_vm6, %v178_v10, %v175_v37  ;;  %v443_v59 = vpop.eup %442  ;;  %460 = vpow2.f32 %v692_v25  ;;  %v88_v45 = vld [vmem:[#allocation2 + $0x28] sm:$0xff]  ;;  %v98_v37 = vld [vmem:[#allocation7 + $0x30] sm:$0xff] }
  0x56   :  { %v230_v3 = vadd.f32 %v181_v0, %v650_v11  ;;  %v445_v43 = vpop.eup %444  ;;  %v292_v12 = vsel %vm103_vm5, %v229_v63, %v277_v49  ;;  %v281_v21 = vmul.f32 0.6931472, %v441_v56  ;;  %462 = vpow2.f32 %v698_v29  ;;  %v96_v11 = vld [vmem:[#allocation7 + $0x20] sm:$0xff] }
  0x57   :  { %317 = vst [vmem:[#allocation8] sm:$0xff] %v308_v57  ;;  %v309_v2 = vadd.f32 %v300_v60, %v84_v52  ;;  %v447_v10 = vpop.eup %446  ;;  %v301_v13 = vmul.f32 %v292_v12, %v94_v62  ;;  %v184_v17 = vmul.f32 0.6931472, %v445_v43  ;;  %v283_v58 = vmul.f32 0.6931472, %v443_v59  ;;  %v99_v60 = vld [vmem:[#allocation7 + $0x38] sm:$0xff] }
  0x58   :  { %v293_v16 = vsel %vm104_vm7, %v230_v3, %v279_v6  ;;  %v193_v22 = vmul.f32 0.6931472, %v447_v10  ;;  %v449_v7 = vpop.eup %448  ;;  %v213_v26 = vadd.f32 1.0, %v212_v20  ;;  %v215_v34 = vand.u32 2147483647, %v725_v9  ;;  %v90_v3 = vld [vmem:[#allocation2 + $0x38] sm:$0xff] }
  0x59   :  { %318 = vst [vmem:[#allocation8 + $0x8] sm:$0xff] %v309_v2  ;;  %v302_v18 = vmul.f32 %v293_v16, %v95_v5  ;;  %v310_v15 = vadd.f32 %v301_v13, %v85_v8  ;;  %v190_v24 = vsel %vm729_vm8, %v187_v36, %v184_v17  ;;  %v451_v28 = vpop.eup %450  ;;  %v285_v41 = vmul.f32 0.6931472, %v449_v7 }
  0x5a   :  { %v231_v27 = vadd.f32 %v190_v24, %v656_v23  ;;  %v199_v25 = vsel %vm735_vm9, %v196_v55, %v193_v22  ;;  %v202_v39 = vmul.f32 0.6931472, %v451_v28  ;;  %v214_v47 = vmul.f32 %v213_v26, %v725_v9 }
  0x5b   :  { %v311_v32 = vadd.f32 %v302_v18, %v86_v14  ;;  %319 = vst [vmem:[#allocation8 + $0x10] sm:$0xff] %v310_v15  ;;  %v232_v29 = vadd.f32 %v199_v25, %v660_v30  ;;  %vm216_vm14 = vcmp.lt.f32.partialorder %v215_v34, 0.0004427343  ;;  %vm109_vm1 = vcmp.gt.f32.partialorder %v675_v51, 20.0 }
  0x5c   :  { %v294_v36 = vsel %vm105_vm10, %v231_v27, %v281_v21  ;;  %v208_v46 = vsel %vm758_vm12, %v205_v4, %v202_v39  ;;  %vm329_vm3 = vcmp.gt.f32.partialorder %v677_v54, 20.0 }
  0x5d   :  { %320 = vst [vmem:[#allocation8 + $0x18] sm:$0xff] %v311_v32  ;;  %v453_v42 = vpop.eup %452  ;;  %v303_v44 = vmul.f32 %v294_v36, %v96_v11  ;;  %v295_v33 = vsel %vm106_vm11, %v232_v29, %v283_v58  ;;  %v233_v23 = vadd.f32 %v208_v46, %v662_v31  ;;  %v100_v58 = vld [vmem:[#allocation7 + $0x40] sm:$0xff]  ;;  %v91_v11 = vld [vmem:[#allocation2 + $0x40] sm:$0xff] }
  0x5e   :  { %v455_v48 = vpop.eup %454  ;;  %v304_v49 = vmul.f32 %v295_v33, %v97_v35  ;;  %v287_v55 = vmul.f32 0.6931472, %v453_v42 }
  0x5f   :  { %v312_v38 = vadd.f32 %v303_v44, %v87_v19  ;;  %v211_v50 = vmul.f32 0.6931472, %v455_v48  ;;  %v457_v52 = vpop.eup %456  ;;  %v296_v30 = vsel %vm107_vm13, %v233_v23, %v285_v41 }
  0x60   :  { %v313_v53 = vadd.f32 %v304_v49, %v88_v45  ;;  %v305_v56 = vmul.f32 %v296_v30, %v98_v37  ;;  %v145_v57 = vmul.f32 0.01, %v457_v52 }
  0x61   :  { %321 = vst [vmem:[#allocation8 + $0x20] sm:$0xff] %v312_v38  ;;  %v217_v9 = vsel %vm216_vm14, %v214_v47, %v211_v50  ;;  %v459_v63 = vpop.eup %458 }
  0x62   :  { %322 = vst [vmem:[#allocation8 + $0x28] sm:$0xff] %v313_v53  ;;  %v234_v62 = vadd.f32 %v217_v9, %v668_v40  ;;  %v314_v0 = vadd.f32 %v305_v56, %v89_v1  ;;  %v218_v59 = vadd.f32 1.0, %v145_v57  ;;  %v461_v5 = vpop.eup %460  ;;  %v271_v61 = vadd.f32 0.01, %v459_v63 }
  0x63   :  { %v463_v31 = vpop.eup %462  ;;  %v333_v43 = vmul.f32 0.01, %v461_v5  ;;  %v221_v4 = vmul.f32 -0.5, %v145_v57  ;;  %v224_v10 = vand.u32 2147483647, %v145_v57 }
  0x64   :  { %v297_v6 = vsel %vm108_vm15, %v234_v62, %v287_v55  ;;  %323 = vst [vmem:[#allocation8 + $0x30] sm:$0xff] %v314_v0  ;;  %464 = vlog2.f32 %v218_v59  ;;  %v347_v2 = vadd.f32 0.01, %v463_v31 }
  0x65   :  { %v306_v20 = vmul.f32 %v297_v6, %v99_v60  ;;  %466 = vlog2.f32 %v271_v61  ;;  %v334_v12 = vadd.f32 1.0, %v333_v43  ;;  %v222_v40 = vadd.f32 1.0, %v221_v4 }
  0x66   :  { %468 = vlog2.f32 %v347_v2  ;;  %v337_v13 = vmul.f32 -0.5, %v333_v43  ;;  %vm225_vm0 = vcmp.lt.f32.partialorder %v224_v10, 0.0004427343  ;;  %v340_v22 = vand.u32 2147483647, %v333_v43 }
  0x67   :  { %v315_v8 = vadd.f32 %v306_v20, %v90_v3  ;;  %470 = vlog2.f32 %v334_v12  ;;  %v223_v14 = vmul.f32 %v222_v40, %v145_v57 }
  0x68   :  { %v338_v17 = vadd.f32 1.0, %v337_v13  ;;  %vm341_vm2 = vcmp.lt.f32.partialorder %v340_v22, 0.0004427343 }
  0x69   :  { %324 = vst [vmem:[#allocation8 + $0x38] sm:$0xff] %v315_v8 }
  0x6a   :  { %v339_v28 = vmul.f32 %v338_v17, %v333_v43 }
  0x71   :  { %v465_v16 = vpop.eup %464 }
  0x72   :  { %v467_v18 = vpop.eup %466  ;;  %v220_v21 = vmul.f32 0.6931472, %v465_v16 }
  0x73   :  { %v289_v7 = vmul.f32 0.6931472, %v467_v18  ;;  %v469_v24 = vpop.eup %468 }
  0x74   :  { %v226_v15 = vsel %vm225_vm0, %v223_v14, %v220_v21  ;;  %v471_v32 = vpop.eup %470  ;;  %v349_v35 = vmul.f32 0.6931472, %v469_v24 }
  0x75   :  { %v235_v26 = vadd.f32 %v226_v15, %v675_v51  ;;  %v336_v25 = vmul.f32 0.6931472, %v471_v32  ;;  %v328_v51 = vld [vmem:[%s810_s3] sm:$0x1] }
  0x77   :  { %v298_v27 = vsel %vm109_vm1, %v235_v26, %v289_v7  ;;  %v342_v29 = vsel %vm341_vm2, %v339_v28, %v336_v25 }
  0x78   :  { %v307_v34 = vmul.f32 %v298_v27, %v100_v58  ;;  %v343_v19 = vadd.f32 %v342_v29, %v677_v54 }
  0x7a   :  { %v316_v39 = vadd.f32 %v307_v34, %v91_v11  ;;  %v350_v36 = vsel %vm329_vm3, %v343_v19, %v349_v35 }
  0x7b   :  { %v351_v41 = vmul.f32 %v350_v36, %v328_v51 }
  0x7c   :  { %325 = vst [vmem:[#allocation8 + $0x40] sm:$0xff] %v316_v39 }
  0x7d   :  { %543 = shalt.err (!%p540_p5)
}
  0x7e   :  { %364 = dma.vmem_to_hbm [thread:$0]  %s359_s13, 1152, %s812_s5, [#allocation4], %s582_s26, %s582_s26, %s583_s27   ;;  %352 = vst [vmem:[#allocation9] sm:$0x1] %v351_v41 }
  0x7f   :  { %s552_s3 = scalar_lea.vmem %s372_s15, 16  ;;  %s556_s21 = scalar_lea.vmem %s372_s15, 32 }
  0x80   :  { %p553_p6 = scmp.ne.s32.totalorder %s372_s15, %s552_s3  ;;  %p557_p7 = scmp.lt.s32.totalorder %s372_s15, %s372_s15 }
  0x81   :  { %p558_p8 = scmp.lt.s32.totalorder %s556_s21, %s552_s3 }
  0x83   :  { %p559_p9 = por %p558_p8, %p557_p7 }
  0x85   :  { %p560_p10 = pnand %p559_p9, %p553_p6 }
  0x87   :  { %563 = shalt.err (!%p560_p10)
}
  0x88   :  { %374 = dma.vmem_to_hbm [thread:$0]  %s372_s15, 16, %s813_s6, [#allocation10]  }
  0x89   :  { %576 = dma.done.wait [#allocation4], 1152  }
  0x8a   :  { %577 = vsyncadd [#allocation4], 4294966144 }
  0x8b   :  { %578 = dma.done.wait [#allocation10], 16  }
  0x8c   :  { %579 = vsyncadd [#allocation10], 4294967280 }
  0x8d   :  { %381 = vsyncpa [#allocation3], 1 }
  0x8e   :  { %382 = vsyncpa [#allocation6], 1 }
  0x8f   :  { %383 = vsyncpa [#allocation4], 1 }
  0x90   :  { %384 = vsyncpa [#allocation10], 1 }

</bundles_post_ra>
